<compile_context>
chip_gen: v5e
topology: v5e:2x2
jax: 0.10.0
libtpu: 0.0.40
codegen_flags: <defaults>
</compile_context>

<pallas_src>
import jax
import jax.numpy as jnp
from jax.experimental import pallas as pl
from jax.experimental.pallas import tpu as pltpu


# ----------------------------------------------------------------------------
# Constants
# ----------------------------------------------------------------------------
VOCAB_SIZE = 33          # ESM-style alphabet size
PAD_TOKEN = 1            # ESM padding token id
SUBLANE = 8              # f32 sublane granularity
VOCAB_PAD = 40           # round_up(33, 8): vocab sits on the SUBLANE axis of the one-hot
CHUNK_M = 256            # tokens per in-kernel sub-chunk (one-hot stays vreg-resident)
DEFAULT_TILE_M = 8192    # tokens per grid step (multiple of CHUNK_M)


def _round_up(x, m):
    return (x + m - 1) // m * m


# ----------------------------------------------------------------------------
# Pallas kernel: folded token -> logits lookup, chunked one-hot, token-major output
# ----------------------------------------------------------------------------
def _token_logits_kernel(tok_ref, tab_ref, o_ref):
    # tok_ref: [TILE_M // CHUNK_M, CHUNK_M]  int32  token ids for this tile
    # tab_ref: [L_pad, VOCAB_PAD]            f32    (embed @ W + b).T, zero-padded
    # o_ref:   [TILE_M, L_pad]               f32    token-major logits
    tab = tab_ref[...]                       # resident: 8x40 f32 = ~1.3 KiB
    num_chunks = tok_ref.shape[0]            # static
    chunk = tok_ref.shape[1]                 # static (= CHUNK_M)
    l_pad = tab.shape[0]

    @pl.loop(0, num_chunks)
    def _(c):
        tok = tok_ref[pl.ds(c, 1), :]                                   # [1, C]
        vid = jax.lax.broadcasted_iota(jnp.int32, (VOCAB_PAD, chunk), 0)
        onehot = (vid == tok).astype(jnp.float32)                       # [V_pad, C]  (10 vregs)
        # [L_pad, V_pad] @ [V_pad, C] -> [L_pad, C]: exact row-select of the folded table.
        res = jnp.dot(tab, onehot, preferred_element_type=jnp.float32)  # [L_pad, C]
        start = pl.multiple_of(c * chunk, chunk)
        # In-kernel transpose (XLU) so the HBM output is already token-major; the
        # wrapper then only slices/reshapes (no separate XLA transpose op).
        o_ref[pl.ds(start, chunk), :] = res.T                           # [C, L_pad]


def fold_classifier_into_table(embed_table, classifier_w, classifier_b):
    """Fold the frozen embedding table and the Linear classifier into one table.

    (embed_table @ W + b)[tok] == embed_table[tok] @ W + b   (exact for a frozen lookup)
    Returns the transposed, (8, 40)-padded table [L_pad, VOCAB_PAD] f32.
    """
    embed_table = jax.lax.stop_gradient(embed_table)          # frozen backbone (no grad)
    _, num_labels = classifier_w.shape
    l_pad = _round_up(num_labels, SUBLANE)
    logits_table = embed_table @ classifier_w + classifier_b[None, :]     # [V, L]
    tab_t = jnp.zeros((l_pad, VOCAB_PAD), jnp.float32)
    tab_t = tab_t.at[:num_labels, :VOCAB_SIZE].set(logits_table.T.astype(jnp.float32))
    return tab_t


def token_logits_forward(tokens, folded_table_t, num_labels, *,
                         tile_m=DEFAULT_TILE_M, core_parallel=False):
    """tokens: [B, S] int32 -> logits [B, S, num_labels] f32 via the folded table."""
    B, S = tokens.shape
    l_pad = folded_table_t.shape[0]
    M = B * S

    # Tile sizing: multiples of CHUNK_M; single full-array block when the batch is small.
    tile_m = max(CHUNK_M, min(_round_up(tile_m, CHUNK_M),
                              _round_up(max(M, 1), CHUNK_M)))
    m_pad = _round_up(max(M, 1), tile_m)
    rows_per_tile = tile_m // CHUNK_M

    tok_flat = jnp.full((m_pad,), PAD_TOKEN, jnp.int32).at[:M].set(tokens.reshape(-1))
    tok2d = tok_flat.reshape(m_pad // CHUNK_M, CHUNK_M)       # dense (sublane+lane) layout

    grid = (m_pad // tile_m,)
    # v7x: only CORE_PARALLEL actually splits the row loop across the 2 TensorCores;
    # keep it off for small batches (split overhead) and non-v7x parts.
    semantics = (pltpu.CORE_PARALLEL,) if core_parallel else ("arbitrary",)

    out = pl.pallas_call(
        _token_logits_kernel,
        out_shape=jax.ShapeDtypeStruct((m_pad, l_pad), jnp.float32),
        grid_spec=pltpu.PrefetchScalarGridSpec(
            num_scalar_prefetch=0,
            grid=grid,
            in_specs=[
                pl.BlockSpec((rows_per_tile, CHUNK_M), lambda i: (i, 0)),   # token ids
                pl.BlockSpec((l_pad, VOCAB_PAD), lambda i: (0, 0)),         # table, resident
            ],
            out_specs=pl.BlockSpec((tile_m, l_pad), lambda i: (i, 0)),
        ),
        compiler_params=pltpu.CompilerParams(
            dimension_semantics=semantics,
            vmem_limit_bytes=32 * 1024 * 1024,
        ),
        cost_estimate=pl.CostEstimate(
            flops=2 * m_pad * VOCAB_PAD * l_pad,
            transcendentals=0,
            bytes_accessed=m_pad * 4 + l_pad * VOCAB_PAD * 4 + m_pad * l_pad * 4,
        ),
    )(tok2d, folded_table_t)

    # Metadata reshape + small slice only (no XLA transpose).
    return out[:M, :num_labels].reshape(B, S, num_labels)


# ----------------------------------------------------------------------------
# Glue mimicking the PyTorch module's forward (tokenization + frozen backbone)
# ----------------------------------------------------------------------------
def simple_batch_converter(original_batch, max_len):
    """Deterministic stand-in for alphabet.get_batch_converter().

    Produces the token matrix AFTER the `[:, 1:-1]` slice (BOS/EOS already removed),
    padded to max_len with PAD_TOKEN.
    """
    toks = []
    for _, seq in original_batch:
        ids = [(ord(c) % (VOCAB_SIZE - 4)) + 4 for c in seq.strip()]
        ids = ids + [PAD_TOKEN] * (max_len - len(ids))
        toks.append(ids)
    return jnp.asarray(toks, dtype=jnp.int32)


def esm_multi_input_0_forward(original_batch, params):
    """Reproduces ESM_MultiInput_0.forward semantics.

    Returns (predictions [B, S, num_labels] float32, max_seq_len int).
    """
    if not isinstance(original_batch[0], tuple):
        original_batch = [(f"seq_{i}", seq.strip()) for i, seq in enumerate(original_batch)]

    max_seq_len = max(len(seq.strip()) for _, seq in original_batch)
    tokenized_batch = simple_batch_converter(original_batch, max_seq_len)  # [B, S]

    num_labels = params["classifier_b"].shape[0]
    # Folded table is precomputed once at init (hoisted out of the per-call path).
    folded_table_t = params.get("logits_table_t")
    if folded_table_t is None:
        folded_table_t = fold_classifier_into_table(
            params["embed_table"], params["classifier_w"], params["classifier_b"])

    predictions = token_logits_forward(tokenized_batch, folded_table_t, num_labels)
    return predictions, max_seq_len


# ----------------------------------------------------------------------------
# Deterministic parameter init + demo
# ----------------------------------------------------------------------------
def init_params(embed_dim=32, num_labels=4):
    key = jax.random.PRNGKey(0)
    k_emb, k_w, k_b = jax.random.split(key, 3)
    embed_table = jax.random.normal(k_emb, (VOCAB_SIZE, embed_dim), dtype=jnp.float32)
    # nn.Linear(embed_dim, num_labels): weight [L, E], bias [L]; stored here as W [E, L]
    bound = 1.0 / (embed_dim ** 0.5)
    classifier_w = jax.random.uniform(
        k_w, (embed_dim, num_labels), dtype=jnp.float32, minval=-bound, maxval=bound)
    classifier_b = jax.random.uniform(
        k_b, (num_labels,), dtype=jnp.float32, minval=-bound, maxval=bound)
    params = {
        "embed_table": embed_table,
        "classifier_w": classifier_w,
        "classifier_b": classifier_b,
    }
    # Hoisted fold: build the padded [L_pad, VOCAB_PAD] logits table once at init.
    params["logits_table_t"] = fold_classifier_into_table(
        embed_table, classifier_w, classifier_b)
    return params


if __name__ == "__main__":
    embed_dim = 32
    num_labels = 4
    params = init_params(embed_dim=embed_dim, num_labels=num_labels)

    # Small synthetic protein batch (batch=2, max seq len = 8)
    original_batch = ["MKTAYIAK", "GAVLK"]

    predictions, max_seq_len = esm_multi_input_0_forward(original_batch, params)
    predictions = jax.block_until_ready(predictions)

    # Cross-check the folded Pallas path against plain JAX: embed[tok] @ W + b
    toks = simple_batch_converter(
        [(f"seq_{i}", s) for i, s in enumerate(original_batch)], max_seq_len)
    ref = params["embed_table"][toks] @ params["classifier_w"] + params["classifier_b"]

    assert predictions.shape == (len(original_batch), max_seq_len, num_labels)
    assert max_seq_len == 8
    assert jnp.allclose(predictions, ref, atol=1e-5, rtol=1e-5)

    print("KERNEL_OK")
</pallas_src>

<mosaic_0001>
module attributes {stable_mosaic.version = 11 : i64} {
  func.func @_token_logits_kernel(%arg0: i32, %arg1: memref<1x256xi32, #tpu.memory_space<vmem>>, %arg2: memref<8x40xf32, #tpu.memory_space<vmem>>, %arg3: memref<256x8xf32, #tpu.memory_space<vmem>>) attributes {dimension_semantics = [#tpu.dimension_semantics<arbitrary>], iteration_bounds = array<i64: 1>, scalar_prefetch = 0 : i64, scratch_operands = 0 : i64, tpu.core_type = #tpu.core_type<tc>, window_params = [{transform_indices = @transform_0, window_bounds = array<i64: 1, 256>}, {pipeline_mode = #tpu.pipeline_mode<synchronous>, transform_indices = @transform_1, window_bounds = array<i64: 8, 40>}, {transform_indices = @transform_2, window_bounds = array<i64: 256, 8>}]} {
    %c0 = arith.constant 0 : index
    %c0_0 = arith.constant 0 : index
    %0 = vector.load %arg2[%c0, %c0_0] : memref<8x40xf32, #tpu.memory_space<vmem>>, vector<8x40xf32>
    %c0_i32 = arith.constant 0 : i32
    %c1_i32 = arith.constant 1 : i32
    %1 = arith.muli %c0_i32, %c1_i32 : i32
    %c0_i32_1 = arith.constant 0 : i32
    %2 = arith.addi %c0_i32_1, %1 : i32
    %3 = arith.index_cast %2 : i32 to index
    %c0_2 = arith.constant 0 : index
    %4 = vector.load %arg1[%3, %c0_2] : memref<1x256xi32, #tpu.memory_space<vmem>>, vector<1x256xi32>
    %5 = tpu.iota {dimensions = array<i32: 0>} : vector<40x256xi32>
    %6 = vector.broadcast %4 : vector<1x256xi32> to vector<40x256xi32>
    %7 = arith.cmpi eq, %5, %6 : vector<40x256xi32>
    %8 = arith.extui %7 : vector<40x256xi1> to vector<40x256xi32>
    %9 = arith.sitofp %8 : vector<40x256xi32> to vector<40x256xf32>
    %cst = arith.constant dense<0.000000e+00> : vector<8x256xf32>
    %10 = tpu.matmul %0, %9, %cst {dimension_numbers = #tpu.dot_dimension_numbers<[1], [0], [0], [1], [0, 0, 1, 1], [], []>} : vector<8x40xf32>, vector<40x256xf32>, vector<8x256xf32> -> vector<8x256xf32>
    %c256_i32 = arith.constant 256 : i32
    %11 = arith.muli %2, %c256_i32 : i32
    %12 = tpu.assume_multiple %11, 256 : i32
    %13 = tpu.transpose %10, [1, 0] : vector<8x256xf32> -> vector<256x8xf32>
    %14 = arith.index_cast %12 : i32 to index
    %c0_3 = arith.constant 0 : index
    %15 = vector.load %arg3[%14, %c0_3] : memref<256x8xf32, #tpu.memory_space<vmem>>, vector<256x8xf32>
    tpu.vector_store %arg3[%14, %c0_3], %13 {strides = array<i32>} : memref<256x8xf32, #tpu.memory_space<vmem>>, vector<256x8xf32>,
    %c1_i32_4 = arith.constant 1 : i32
    return
  }
  func.func @transform_0(%arg0: i32) -> (i32, i32) {
    %c0_i32 = arith.constant 0 : i32
    %c0_i32_0 = arith.constant 0 : i32
    return %arg0, %c0_i32 : i32, i32
  }
  func.func @transform_1(%arg0: i32) -> (i32, i32) {
    %c0_i32 = arith.constant 0 : i32
    %c0_i32_0 = arith.constant 0 : i32
    %c0_i32_1 = arith.constant 0 : i32
    return %c0_i32, %c0_i32_0 : i32, i32
  }
  func.func @transform_2(%arg0: i32) -> (i32, i32) {
    %c0_i32 = arith.constant 0 : i32
    %c0_i32_0 = arith.constant 0 : i32
    return %arg0, %c0_i32 : i32, i32
  }
}

</mosaic_0001>

<bundles_post_ra>
// kernel: tpu_custom_call.1
= control target key start
LH: loop header
LB: loop body
LE: loop exit
PB: predicated region body
PF: predicated region fallthrough
CT: control target
= control target key end

     0   :  { %7 = vsyncpa [#allocation3], 0  ;;  %s456_s0 = inlined_call_operand.hbm [shape: s32[1,256], index: 0, kind: input, shape index: {}]   ;;  %s457_s1 = inlined_call_operand.hbm [shape: f32[8,40], index: 1, kind: input, shape index: {}]   ;;  %s458_s2 = inlined_call_operand.vmem [shape: f32[256,8], index: 2, kind: output, shape index: {}]  }
   0x1   :  { %s14_s11 = sshll.u32 %s456_s0, 4  ;;  %s15_s11 = int_to_ptr.hbm [resolvable:$true] %s14_s11 }
   0x2   :  { %8 = vsyncpa [#allocation5], 0  ;;  %s304_s12 = smov [#allocation2]   ;;  %s25_s16 = sshll.u32 %s457_s1, 4  ;;  %s26_s16 = int_to_ptr.hbm [resolvable:$true] %s25_s16 }
   0x3   :  { %s16_s13 = sshll.u32 %s304_s12, 4  ;;  %s305_s17 = smov [#allocation4]   ;;  %s17_s13 = int_to_ptr.vmem [resolvable:$true] %s16_s13 }
   0x4   :  { %19 = dma.hbm_to_vmem [thread:$0]  %s15_s11, 32, %s17_s13, [#allocation3]  }
   0x5   :  { %s27_s18 = sshll.u32 %s305_s17, 4  ;;  %s28_s18 = int_to_ptr.vmem [resolvable:$true] %s27_s18 }
   0x6   :  { %30 = dma.hbm_to_vmem [thread:$0]  %s26_s16, 128, %s28_s18, [#allocation5]  }
   0x7   :  { %300 = dma.done.wait [#allocation3], 32  }
   0x8   :  { %301 = vsyncadd [#allocation3], 4294967264 }
   0x9   :  { %302 = dma.done.wait [#allocation5], 128  }
   0xa   :  { %303 = vsyncadd [#allocation5], 4294967168  ;;  %v41_v0 = vlaneseq  ;;  %v40_v4 = vld [vmem:[#allocation2] sm:$0x3]  ;;  %v306_v9 = vmov 1.0   ;;  %v39_v10 = vld [vmem:[#allocation4] sm:$0xff] }
   0xb   :  { %v47_v5 = vperm.slane %v40_v4, 0  ;;  %v48_v7 = vperm.slane %v40_v4, 1  ;;  %vm79_vm8 = vcmask 326656   ;;  %vm187_vm11 = vcmask 64512  }
   0xc   :  { %v42_v1 = vshrl.u32 %v41_v0, 7 }
   0xe   :  { %v46_v2 = vadd.s32 32, %v42_v1  ;;  %v45_v3 = vadd.s32 24, %v42_v1  ;;  %v44_v6 = vadd.s32 16, %v42_v1  ;;  %v43_v8 = vadd.s32 8, %v42_v1 }
   0xf   :  { %vm49_vm7 = vcmp.eq.s32.totalorder %v42_v1, %v47_v5  ;;  %vm50_vm10 = vcmp.eq.s32.totalorder %v42_v1, %v48_v7 }
  0x10   :  { %vm57_vm0 = vcmp.eq.s32.totalorder %v46_v2, %v47_v5  ;;  %vm55_vm1 = vcmp.eq.s32.totalorder %v45_v3, %v47_v5  ;;  %vm58_vm2 = vcmp.eq.s32.totalorder %v46_v2, %v48_v7  ;;  %vm56_vm3 = vcmp.eq.s32.totalorder %v45_v3, %v48_v7 }
  0x11   :  { %236 = vmatpush.msk.msra.mxu0 %vm57_vm0, %v306_v9  ;;  %vm53_vm4 = vcmp.eq.s32.totalorder %v44_v6, %v47_v5  ;;  %242 = vmatpush.msk.msra.mxu1 %vm58_vm2, %v306_v9  ;;  %vm54_vm5 = vcmp.eq.s32.totalorder %v44_v6, %v48_v7  ;;  %vm51_vm6 = vcmp.eq.s32.totalorder %v43_v8, %v47_v5 }
  0x12   :  { %vm52_vm9 = vcmp.eq.s32.totalorder %v43_v8, %v48_v7 }
  0x13   :  { %237 = vmatpush.msk.msra.mxu0 %vm55_vm1, %v306_v9  ;;  %243 = vmatpush.msk.msra.mxu1 %vm56_vm3, %v306_v9 }
  0x15   :  { %238 = vmatpush.msk.msra.mxu0 %vm53_vm4, %v306_v9  ;;  %244 = vmatpush.msk.msra.mxu1 %vm54_vm5, %v306_v9 }
  0x17   :  { %239 = vmatpush.msk.msra.mxu0 %vm51_vm6, %v306_v9  ;;  %245 = vmatpush.msk.msra.mxu1 %vm52_vm9, %v306_v9 }
  0x19   :  { %240 = vmatpush.msk.msra.mxu0 %vm49_vm7, %v306_v9  ;;  %246 = vmatpush.msk.msra.mxu1 %vm50_vm10, %v306_v9 }
  0x1a   :  { %241 = vmatmul.msk.f32.vlgmr.msra.gmra.mxu0 %vm79_vm8, %v39_v10  ;;  %247 = vmatmul.msk.f32.vlgmr.msra.gmra.mxu1 %vm79_vm8, %v39_v10 }
  0x97   :  { %v100_v11 = vpop.f32.mrf.mxu0  ;;  %v120_v12 = vpop.f32.mrf.mxu1 }
  0x98   :  { %123 = vxpose.xlu0.b32.start.end [1/1] (short) %v100_v11, 128 }
 0x118   :  { %155 = vxpose.xlu0.b32.start.end [1/1] (short) %v120_v12, 128 }
 0x13c   :  { %v139_v13 = vpop.trf.xlu0 }
 0x13d   :  { %188 = vst.msk [vmem:[%s458_s2] sm:$0xff] %vm187_vm11, %v139_v13 }
 0x144   :  { %v140_v14 = vpop.trf.xlu0 }
 0x145   :  { %189 = vst.msk [vmem:[%s458_s2 + $0x8] sm:$0xff] %vm187_vm11, %v140_v14 }
 0x14c   :  { %v141_v15 = vpop.trf.xlu0 }
 0x14d   :  { %190 = vst.msk [vmem:[%s458_s2 + $0x10] sm:$0xff] %vm187_vm11, %v141_v15 }
 0x154   :  { %v142_v16 = vpop.trf.xlu0 }
 0x155   :  { %191 = vst.msk [vmem:[%s458_s2 + $0x18] sm:$0xff] %vm187_vm11, %v142_v16 }
 0x15c   :  { %v143_v17 = vpop.trf.xlu0 }
 0x15d   :  { %192 = vst.msk [vmem:[%s458_s2 + $0x20] sm:$0xff] %vm187_vm11, %v143_v17 }
 0x164   :  { %v144_v18 = vpop.trf.xlu0 }
 0x165   :  { %193 = vst.msk [vmem:[%s458_s2 + $0x28] sm:$0xff] %vm187_vm11, %v144_v18 }
 0x16c   :  { %v145_v19 = vpop.trf.xlu0 }
 0x16d   :  { %194 = vst.msk [vmem:[%s458_s2 + $0x30] sm:$0xff] %vm187_vm11, %v145_v19 }
 0x174   :  { %v146_v20 = vpop.trf.xlu0 }
 0x175   :  { %195 = vst.msk [vmem:[%s458_s2 + $0x38] sm:$0xff] %vm187_vm11, %v146_v20 }
 0x17c   :  { %v147_v21 = vpop.trf.xlu0 }
 0x17d   :  { %196 = vst.msk [vmem:[%s458_s2 + $0x40] sm:$0xff] %vm187_vm11, %v147_v21 }
 0x184   :  { %v148_v22 = vpop.trf.xlu0 }
 0x185   :  { %197 = vst.msk [vmem:[%s458_s2 + $0x48] sm:$0xff] %vm187_vm11, %v148_v22 }
 0x18c   :  { %v149_v23 = vpop.trf.xlu0 }
 0x18d   :  { %198 = vst.msk [vmem:[%s458_s2 + $0x50] sm:$0xff] %vm187_vm11, %v149_v23 }
 0x194   :  { %v150_v24 = vpop.trf.xlu0 }
 0x195   :  { %199 = vst.msk [vmem:[%s458_s2 + $0x58] sm:$0xff] %vm187_vm11, %v150_v24 }
 0x19c   :  { %v151_v25 = vpop.trf.xlu0 }
 0x19d   :  { %200 = vst.msk [vmem:[%s458_s2 + $0x60] sm:$0xff] %vm187_vm11, %v151_v25 }
 0x1a4   :  { %v152_v26 = vpop.trf.xlu0 }
 0x1a5   :  { %201 = vst.msk [vmem:[%s458_s2 + $0x68] sm:$0xff] %vm187_vm11, %v152_v26 }
 0x1ac   :  { %v153_v27 = vpop.trf.xlu0 }
 0x1ad   :  { %202 = vst.msk [vmem:[%s458_s2 + $0x70] sm:$0xff] %vm187_vm11, %v153_v27 }
 0x1b4   :  { %v154_v28 = vpop.trf.xlu0 }
 0x1b5   :  { %203 = vst.msk [vmem:[%s458_s2 + $0x78] sm:$0xff] %vm187_vm11, %v154_v28 }
 0x1bc   :  { %v171_v29 = vpop.trf.xlu0 }
 0x1bd   :  { %204 = vst.msk [vmem:[%s458_s2 + $0x80] sm:$0xff] %vm187_vm11, %v171_v29 }
 0x1c4   :  { %v172_v30 = vpop.trf.xlu0 }
 0x1c5   :  { %205 = vst.msk [vmem:[%s458_s2 + $0x88] sm:$0xff] %vm187_vm11, %v172_v30 }
 0x1cc   :  { %v173_v31 = vpop.trf.xlu0 }
 0x1cd   :  { %206 = vst.msk [vmem:[%s458_s2 + $0x90] sm:$0xff] %vm187_vm11, %v173_v31 }
 0x1d4   :  { %v174_v32 = vpop.trf.xlu0 }
 0x1d5   :  { %207 = vst.msk [vmem:[%s458_s2 + $0x98] sm:$0xff] %vm187_vm11, %v174_v32 }
 0x1dc   :  { %v175_v33 = vpop.trf.xlu0 }
 0x1dd   :  { %208 = vst.msk [vmem:[%s458_s2 + $0xa0] sm:$0xff] %vm187_vm11, %v175_v33 }
 0x1e4   :  { %v176_v34 = vpop.trf.xlu0 }
 0x1e5   :  { %209 = vst.msk [vmem:[%s458_s2 + $0xa8] sm:$0xff] %vm187_vm11, %v176_v34 }
 0x1ec   :  { %v177_v35 = vpop.trf.xlu0 }
 0x1ed   :  { %210 = vst.msk [vmem:[%s458_s2 + $0xb0] sm:$0xff] %vm187_vm11, %v177_v35 }
 0x1f4   :  { %v178_v36 = vpop.trf.xlu0 }
 0x1f5   :  { %211 = vst.msk [vmem:[%s458_s2 + $0xb8] sm:$0xff] %vm187_vm11, %v178_v36 }
 0x1fc   :  { %v179_v37 = vpop.trf.xlu0 }
 0x1fd   :  { %212 = vst.msk [vmem:[%s458_s2 + $0xc0] sm:$0xff] %vm187_vm11, %v179_v37 }
 0x204   :  { %v180_v38 = vpop.trf.xlu0 }
 0x205   :  { %213 = vst.msk [vmem:[%s458_s2 + $0xc8] sm:$0xff] %vm187_vm11, %v180_v38 }
 0x20c   :  { %v181_v39 = vpop.trf.xlu0 }
 0x20d   :  { %214 = vst.msk [vmem:[%s458_s2 + $0xd0] sm:$0xff] %vm187_vm11, %v181_v39 }
 0x214   :  { %v182_v40 = vpop.trf.xlu0 }
 0x215   :  { %215 = vst.msk [vmem:[%s458_s2 + $0xd8] sm:$0xff] %vm187_vm11, %v182_v40 }
 0x21c   :  { %v183_v41 = vpop.trf.xlu0 }
 0x21d   :  { %216 = vst.msk [vmem:[%s458_s2 + $0xe0] sm:$0xff] %vm187_vm11, %v183_v41 }
 0x224   :  { %v184_v42 = vpop.trf.xlu0 }
 0x225   :  { %217 = vst.msk [vmem:[%s458_s2 + $0xe8] sm:$0xff] %vm187_vm11, %v184_v42 }
 0x22c   :  { %v185_v43 = vpop.trf.xlu0 }
 0x22d   :  { %218 = vst.msk [vmem:[%s458_s2 + $0xf0] sm:$0xff] %vm187_vm11, %v185_v43 }
 0x234   :  { %v186_v44 = vpop.trf.xlu0 }
 0x235   :  { %219 = vst.msk [vmem:[%s458_s2 + $0xf8] sm:$0xff] %vm187_vm11, %v186_v44 }
 0x236   :  { %224 = vsyncpa [#allocation3], 1 }
 0x237   :  { %225 = vsyncpa [#allocation5], 1 }

</bundles_post_ra>
